<compile_context>
chip_gen: v7x
topology: tpu7x:2x2x1
jax: 0.10.0
libtpu: 0.0.40
codegen_flags: <defaults>
</compile_context>

<pallas_src>
import functools

import jax
import jax.numpy as jnp
from jax import lax
from jax.experimental import pallas as pl
from jax.experimental.pallas import tpu as pltpu


EPS = 1e-5          # nn.InstanceNorm2d default eps
NEG_SLOPE = 0.2     # LeakyReLU(0.2)


# ----------------------------------------------------------------------------
# VMEM budget / tiling plan (generation aware).
# ----------------------------------------------------------------------------
def _vmem_capacity_bytes():
    """Physical VMEM per TensorCore (v5e/v6e: 128 MiB, v7x: 64 MiB)."""
    try:
        cap = getattr(pltpu.get_tpu_info(), "vmem_capacity_bytes", None)
        if cap:
            return int(cap)
    except Exception:
        pass
    return 64 << 20   # conservative (v7x-class) default


def _round_up(x, m):
    return -(-x // m) * m


def _plan(K, cout, P, force_fallback):
    """Pick lane tile tp (multiple of 128), padded P, and fused vs 2-call path."""
    budget = int(0.70 * _vmem_capacity_bytes())   # leave headroom (esp. v7x)
    p128 = _round_up(P, 128)
    max_tile = min(8192, p128)

    def tile_bytes(tp, fused):
        p_pad = _round_up(P, tp)
        b = (2 * K * tp * 2            # bf16 patch tile, double-buffered
             + 2 * cout * tp * 4       # f32 output tile, double-buffered
             + 2 * cout * K * 2        # bf16 weights (headroom for 2 buffers)
             + 64 * cout + 4096)       # small stats scratch + slack
        if fused:
            b += cout * p_pad * 4      # per-sample y resident in VMEM scratch
        else:
            b += 2 * cout * tp * 2     # bf16 y HBM tile (stage-1 out / stage-2 in)
        return b, p_pad

    if not force_fallback:
        for tp in range(max_tile, 0, -128):
            b, p_pad = tile_bytes(tp, fused=True)
            if b <= budget:
                return dict(fused=True, tp=tp, p_pad=p_pad, p_tiles=p_pad // tp,
                            vmem_limit=int(min(budget, max(32 << 20, 2 * b))))
    for tp in range(max_tile, 0, -128):
        b, p_pad = tile_bytes(tp, fused=False)
        if b <= budget:
            return dict(fused=False, tp=tp, p_pad=p_pad, p_tiles=p_pad // tp,
                        vmem_limit=int(min(budget, max(32 << 20, 2 * b))))
    tp = 128
    _, p_pad = tile_bytes(tp, fused=False)
    return dict(fused=False, tp=tp, p_pad=p_pad, p_tiles=p_pad // tp,
                vmem_limit=budget)


# ----------------------------------------------------------------------------
# Fused kernel: pass 0 = conv matmul + sum into resident VMEM y;
#               pass 1 = masked two-pass variance, InstanceNorm + LeakyReLU.
# ----------------------------------------------------------------------------
def fused_conv_in_lrelu_kernel(p_ref, w_ref, o_ref, y_sc, sum_sc, inv_sc,
                               *, inv_p, true_p):
    # p_ref : (1, K, TP) bf16 patches (lane dim = spatial tile)
    # w_ref : (Cout, K)  bf16 weights (resident; constant index_map)
    # o_ref : (1, Cout, TP) f32 normalized+activated output (lane-dense)
    # y_sc  : (Cout, P_pad) f32 per-sample conv output, resident in VMEM
    # sum_sc: (Cout, 1) f32 running sum in pass 0, holds mean in pass 1
    # inv_sc: (Cout, 1) f32 1/sqrt(var + eps)
    s = pl.program_id(1)          # 0: conv+stats, 1: normalize
    j = pl.program_id(2)          # spatial tile
    tp = o_ref.shape[-1]
    start = pl.multiple_of(j * tp, 128)

    @pl.when(s == 0)
    def _():
        @pl.when(j == 0)
        def _():
            sum_sc[...] = jnp.zeros_like(sum_sc)

        # Conv as matmul on the MXU: (Cout, K) @ (K, TP) -> (Cout, TP), f32.
        # Bias omitted: exactly cancelled by InstanceNorm (affine=False).
        y = jnp.dot(w_ref[...], p_ref[0], preferred_element_type=jnp.float32)
        y_sc[:, pl.ds(start, tp)] = y
        sum_sc[...] += jnp.sum(y, axis=1, keepdims=True)

    @pl.when(s == 1)
    def _():
        @pl.when(j == 0)
        def _():
            # Two-pass variance from the VMEM-resident y (cancellation-safe);
            # mask padded spatial columns past the true P.
            mean = sum_sc[...] * inv_p
            col = lax.broadcasted_iota(jnp.int32, y_sc.shape, 1)
            d = jnp.where(col < true_p, y_sc[...] - mean, 0.0)
            var = jnp.sum(d * d, axis=1, keepdims=True) * inv_p
            sum_sc[...] = mean                       # reuse: now holds mean
            inv_sc[...] = lax.rsqrt(var + EPS)

        y = y_sc[:, pl.ds(start, tp)]
        yn = (y - sum_sc[...]) * inv_sc[...]
        o_ref[0] = jnp.where(yn >= 0, yn, NEG_SLOPE * yn).astype(o_ref.dtype)


# ----------------------------------------------------------------------------
# Fallback two-call path (y too large for VMEM): bf16 intermediate y in HBM.
# ----------------------------------------------------------------------------
def conv_stats_kernel(p_ref, w_ref, y_ref, sum_ref, sq_ref):
    j = pl.program_id(1)

    @pl.when(j == 0)
    def _():
        sum_ref[...] = jnp.zeros_like(sum_ref)
        sq_ref[...] = jnp.zeros_like(sq_ref)

    y = jnp.dot(w_ref[...], p_ref[0], preferred_element_type=jnp.float32)
    y_ref[0] = y.astype(y_ref.dtype)              # bf16 store: halves y traffic
    sum_ref[0] += jnp.sum(y, axis=1, keepdims=True)
    sq_ref[0] += jnp.sum(y * y, axis=1, keepdims=True)


def norm_lrelu_kernel(y_ref, sum_ref, sq_ref, o_ref, *, inv_p):
    y = y_ref[0].astype(jnp.float32)              # (Cout, TP)
    mean = sum_ref[0] * inv_p
    var = jnp.maximum(sq_ref[0] * inv_p - mean * mean, 0.0)
    inv = lax.rsqrt(var + EPS)
    yn = (y - mean) * inv
    o_ref[0] = jnp.where(yn >= 0, yn, NEG_SLOPE * yn).astype(o_ref.dtype)


# ----------------------------------------------------------------------------
# Glue: reflect-pad + im2col -> (N, K, P), K ordered (cin, kh, kw) to match
# weight.reshape(Cout, Cin*kh*kw).
# ----------------------------------------------------------------------------
def _im2col_reflect_kp(x, kernel=4, stride=2, pad=1):
    n, c, h, w = x.shape
    xp = jnp.pad(x, ((0, 0), (0, 0), (pad, pad), (pad, pad)), mode="reflect")
    ho = (h + 2 * pad - kernel) // stride + 1
    wo = (w + 2 * pad - kernel) // stride + 1
    slabs = []
    for kh in range(kernel):
        for kw in range(kernel):
            slabs.append(
                xp[:, :, kh: kh + stride * (ho - 1) + 1: stride,
                       kw: kw + stride * (wo - 1) + 1: stride])
    patches = jnp.stack(slabs, axis=2)            # (N, C, k*k, Ho, Wo)
    return patches.reshape(n, c * kernel * kernel, ho * wo), ho, wo


@functools.partial(jax.jit, static_argnames=("stride", "force_fallback"))
def block_forward(x, weight, bias, stride=2, force_fallback=False):
    """Equivalent of Block.forward. x: (N, Cin, H, W) NCHW; weight (Cout,Cin,4,4)."""
    del bias   # exactly cancelled by InstanceNorm2d(affine=False) that follows
    n = x.shape[0]
    cout, cin, kh, kw = weight.shape
    patches, ho, wo = _im2col_reflect_kp(x, kernel=kh, stride=stride, pad=1)
    _, K, P = patches.shape

    plan = _plan(K, cout, P, force_fallback)
    tp, p_pad, p_tiles = plan["tp"], plan["p_pad"], plan["p_tiles"]
    vmem_limit = plan["vmem_limit"]

    # Zero-pad P to a multiple of tp: zero patch columns -> zero conv columns,
    # which add 0 to sum/sumsq, so stats with inv_p = 1/true_P remain exact.
    if p_pad != P:
        patches = jnp.pad(patches, ((0, 0), (0, 0), (0, p_pad - P)))

    patches_bf = patches.astype(jnp.bfloat16)
    w_mat = weight.reshape(cout, cin * kh * kw).astype(jnp.bfloat16)   # (Cout, K)

    if plan["fused"]:
        out_p = pl.pallas_call(
            functools.partial(fused_conv_in_lrelu_kernel,
                              inv_p=1.0 / P, true_p=P),
            out_shape=jax.ShapeDtypeStruct((n, cout, p_pad), jnp.float32),
            grid=(n, 2, p_tiles),
            in_specs=[
                # Pass 1 pins the last tile index -> patch DMA elided (no re-read).
                pl.BlockSpec(
                    (1, K, tp),
                    lambda i, s, j: (i, 0, (1 - s) * j + s * (p_tiles - 1))),
                pl.BlockSpec((cout, K), lambda i, s, j: (0, 0)),
            ],
            # Pass 0 keeps the output block index constant (nothing flushed);
            # pass 1 writes every tile lane-dense.
            out_specs=pl.BlockSpec((1, cout, tp), lambda i, s, j: (i, 0, s * j)),
            scratch_shapes=[
                pltpu.VMEM((cout, p_pad), jnp.float32),   # resident y
                pltpu.VMEM((cout, 1), jnp.float32),       # sum -> mean
                pltpu.VMEM((cout, 1), jnp.float32),       # 1/sqrt(var+eps)
            ],
            compiler_params=pltpu.CompilerParams(
                dimension_semantics=("parallel", "arbitrary", "arbitrary"),
                vmem_limit_bytes=vmem_limit,
            ),
        )(patches_bf, w_mat)
    else:
        y, s1, s2 = pl.pallas_call(
            conv_stats_kernel,
            out_shape=(
                jax.ShapeDtypeStruct((n, cout, p_pad), jnp.bfloat16),
                jax.ShapeDtypeStruct((n, cout, 1), jnp.float32),
                jax.ShapeDtypeStruct((n, cout, 1), jnp.float32),
            ),
            grid=(n, p_tiles),
            in_specs=[
                pl.BlockSpec((1, K, tp), lambda i, j: (i, 0, j)),
                pl.BlockSpec((cout, K), lambda i, j: (0, 0)),
            ],
            out_specs=(
                pl.BlockSpec((1, cout, tp), lambda i, j: (i, 0, j)),
                pl.BlockSpec((1, cout, 1), lambda i, j: (i, 0, 0)),
                pl.BlockSpec((1, cout, 1), lambda i, j: (i, 0, 0)),
            ),
            compiler_params=pltpu.CompilerParams(
                dimension_semantics=("parallel", "arbitrary"),
                vmem_limit_bytes=vmem_limit,
            ),
        )(patches_bf, w_mat)

        out_p = pl.pallas_call(
            functools.partial(norm_lrelu_kernel, inv_p=1.0 / P),
            out_shape=jax.ShapeDtypeStruct((n, cout, p_pad), jnp.float32),
            grid=(n, p_tiles),
            in_specs=[
                pl.BlockSpec((1, cout, tp), lambda i, j: (i, 0, j)),
                pl.BlockSpec((1, cout, 1), lambda i, j: (i, 0, 0)),
                pl.BlockSpec((1, cout, 1), lambda i, j: (i, 0, 0)),
            ],
            out_specs=pl.BlockSpec((1, cout, tp), lambda i, j: (i, 0, j)),
            compiler_params=pltpu.CompilerParams(
                dimension_semantics=("parallel", "parallel"),
                vmem_limit_bytes=vmem_limit,
            ),
        )(y, s1, s2)

    # Drop the padded spatial tail; (N, Cout, P) -> NCHW is a pure reshape.
    return out_p[:, :, :P].reshape(n, cout, ho, wo)


# ----------------------------------------------------------------------------
# Pure-JAX reference for validation (same bf16 conv inputs, f32 accumulation).
# ----------------------------------------------------------------------------
def _reference(x, weight, bias, stride=2):
    xp = jnp.pad(x, ((0, 0), (0, 0), (1, 1), (1, 1)), mode="reflect")
    y = lax.conv_general_dilated(
        xp.astype(jnp.bfloat16), weight.astype(jnp.bfloat16),
        window_strides=(stride, stride), padding="VALID",
        dimension_numbers=("NCHW", "OIHW", "NCHW"),
        preferred_element_type=jnp.float32,
    ) + bias.reshape(1, -1, 1, 1).astype(jnp.float32)
    mean = jnp.mean(y, axis=(2, 3), keepdims=True)
    var = jnp.mean((y - mean) ** 2, axis=(2, 3), keepdims=True)
    yn = (y - mean) * lax.rsqrt(var + EPS)
    return jnp.where(yn >= 0, yn, NEG_SLOPE * yn)


if __name__ == "__main__":
    key = jax.random.PRNGKey(0)
    k_x, k_w, k_b = jax.random.split(key, 3)

    N, C_IN, C_OUT, H, W, STRIDE = 2, 4, 8, 16, 16, 2

    x = jax.random.normal(k_x, (N, C_IN, H, W), dtype=jnp.float32)
    # Deterministic synthetic params (shapes from nn.Conv2d(C_IN, C_OUT, 4)).
    weight = 0.1 * jax.random.normal(k_w, (C_OUT, C_IN, 4, 4), dtype=jnp.float32)
    bias = 0.1 * jax.random.normal(k_b, (C_OUT,), dtype=jnp.float32)

    ref = jax.block_until_ready(_reference(x, weight, bias, stride=STRIDE))

    # Primary (fused, single pallas_call) path.
    out = jax.block_until_ready(block_forward(x, weight, bias, stride=STRIDE))
    assert out.shape == (N, C_OUT, H // STRIDE, W // STRIDE), out.shape
    assert jnp.allclose(out, ref, atol=2e-3, rtol=2e-3), float(
        jnp.max(jnp.abs(out - ref)))

    # Also exercise the two-call fallback (bf16 intermediate y) path.
    out_fb = jax.block_until_ready(
        block_forward(x, weight, bias, stride=STRIDE, force_fallback=True))
    assert out_fb.shape == out.shape, out_fb.shape
    assert jnp.allclose(out_fb, ref, atol=1e-2, rtol=1e-2), float(
        jnp.max(jnp.abs(out_fb - ref)))

    print("KERNEL_OK")
</pallas_src>

<mosaic_0001>
module attributes {stable_mosaic.version = 11 : i64} {
  func.func @fused_conv_in_lrelu_kernel(%arg0: i32, %arg1: i32, %arg2: i32, %arg3: memref<1x64x128xbf16, #tpu.memory_space<vmem>>, %arg4: memref<8x64xbf16, #tpu.memory_space<vmem>>, %arg5: memref<1x8x128xf32, #tpu.memory_space<vmem>>, %arg6: memref<8x128xf32, #tpu.memory_space<vmem>>, %arg7: memref<8x1xf32, #tpu.memory_space<vmem>>, %arg8: memref<8x1xf32, #tpu.memory_space<vmem>>) attributes {dimension_semantics = [#tpu.dimension_semantics<parallel>, #tpu.dimension_semantics<arbitrary>, #tpu.dimension_semantics<arbitrary>], iteration_bounds = array<i64: 2, 2, 1>, scalar_prefetch = 0 : i64, scratch_operands = 3 : i64, tpu.core_type = #tpu.core_type<tc>, window_params = [{transform_indices = @transform_0, window_bounds = array<i64: 1, 64, 128>}, {pipeline_mode = #tpu.pipeline_mode<synchronous>, transform_indices = @transform_1, window_bounds = array<i64: 8, 64>}, {transform_indices = @transform_2, window_bounds = array<i64: 1, 8, 128>}]} {
    %c128_i32 = arith.constant 128 : i32
    %0 = arith.muli %arg2, %c128_i32 : i32
    %1 = tpu.assume_multiple %0, 128 : i32
    %c0_i32 = arith.constant 0 : i32
    %2 = arith.cmpi eq, %arg1, %c0_i32 : i32
    %3 = arith.extui %2 : i1 to i32
    %c0_i32_0 = arith.constant 0 : i32
    %4 = arith.cmpi ne, %3, %c0_i32_0 : i32
    scf.if %4 {
      %c0_i32_2 = arith.constant 0 : i32
      %8 = arith.cmpi eq, %arg2, %c0_i32_2 : i32
      %9 = arith.extui %8 : i1 to i32
      %c0_i32_3 = arith.constant 0 : i32
      %10 = arith.cmpi ne, %9, %c0_i32_3 : i32
      scf.if %10 {
        %cst_14 = arith.constant 0.000000e+00 : f32
        %22 = vector.broadcast %cst_14 : f32 to vector<8x1xf32>
        %c0_15 = arith.constant 0 : index
        %c0_16 = arith.constant 0 : index
        %23 = vector.load %arg7[%c0_15, %c0_16] : memref<8x1xf32, #tpu.memory_space<vmem>>, vector<8x1xf32>
        tpu.vector_store %arg7[%c0_15, %c0_16], %22 {strides = array<i32>} : memref<8x1xf32, #tpu.memory_space<vmem>>, vector<8x1xf32>,
      } else {
      }
      %c0 = arith.constant 0 : index
      %c0_4 = arith.constant 0 : index
      %11 = vector.load %arg4[%c0, %c0_4] : memref<8x64xbf16, #tpu.memory_space<vmem>>, vector<8x64xbf16>
      %c0_5 = arith.constant 0 : index
      %c0_6 = arith.constant 0 : index
      %c0_7 = arith.constant 0 : index
      %12 = vector.load %arg3[%c0_5, %c0_6, %c0_7] : memref<1x64x128xbf16, #tpu.memory_space<vmem>>, vector<1x64x128xbf16>
      %13 = vector.shape_cast %12 : vector<1x64x128xbf16> to vector<64x128xbf16>
      %cst = arith.constant dense<0.000000e+00> : vector<8x128xf32>
      %14 = tpu.matmul %11, %13, %cst {dimension_numbers = #tpu.dot_dimension_numbers<[1], [0], [0], [1], [0, 0, 1, 1], [], []>} : vector<8x64xbf16>, vector<64x128xbf16>, vector<8x128xf32> -> vector<8x128xf32>
      %c0_8 = arith.constant 0 : index
      %15 = arith.index_cast %1 : i32 to index
      %16 = vector.load %arg6[%c0_8, %15] : memref<8x128xf32, #tpu.memory_space<vmem>>, vector<8x128xf32>
      tpu.vector_store %arg6[%c0_8, %15], %14 {strides = array<i32>} : memref<8x128xf32, #tpu.memory_space<vmem>>, vector<8x128xf32>,
      %c0_9 = arith.constant 0 : index
      %c0_10 = arith.constant 0 : index
      %17 = vector.load %arg7[%c0_9, %c0_10] : memref<8x1xf32, #tpu.memory_space<vmem>>, vector<8x1xf32>
      %cst_11 = arith.constant dense<0.000000e+00> : vector<8xf32>
      %18 = vector.multi_reduction <add>, %14, %cst_11 [1] : vector<8x128xf32> to vector<8xf32>
      %19 = vector.shape_cast %18 : vector<8xf32> to vector<8x1xf32>
      %20 = arith.addf %17, %19 : vector<8x1xf32>
      %c0_12 = arith.constant 0 : index
      %c0_13 = arith.constant 0 : index
      %21 = vector.load %arg7[%c0_12, %c0_13] : memref<8x1xf32, #tpu.memory_space<vmem>>, vector<8x1xf32>
      tpu.vector_store %arg7[%c0_12, %c0_13], %20 {strides = array<i32>} : memref<8x1xf32, #tpu.memory_space<vmem>>, vector<8x1xf32>,
    } else {
    }
    %c1_i32 = arith.constant 1 : i32
    %5 = arith.cmpi eq, %arg1, %c1_i32 : i32
    %6 = arith.extui %5 : i1 to i32
    %c0_i32_1 = arith.constant 0 : i32
    %7 = arith.cmpi ne, %6, %c0_i32_1 : i32
    scf.if %7 {
      %c0_i32_2 = arith.constant 0 : i32
      %8 = arith.cmpi eq, %arg2, %c0_i32_2 : i32
      %9 = arith.extui %8 : i1 to i32
      %c0_i32_3 = arith.constant 0 : i32
      %10 = arith.cmpi ne, %9, %c0_i32_3 : i32
      scf.if %10 {
        %c0_12 = arith.constant 0 : index
        %c0_13 = arith.constant 0 : index
        %27 = vector.load %arg7[%c0_12, %c0_13] : memref<8x1xf32, #tpu.memory_space<vmem>>, vector<8x1xf32>
        %cst_14 = arith.constant 1.562500e-02 : f32
        %28 = vector.broadcast %cst_14 : f32 to vector<8x1xf32>
        %29 = arith.mulf %27, %28 : vector<8x1xf32>
        %30 = tpu.iota {dimensions = array<i32: 1>} : vector<8x128xi32>
        %c64_i32 = arith.constant 64 : i32
        %31 = vector.broadcast %c64_i32 : i32 to vector<8x128xi32>
        %32 = arith.cmpi slt, %30, %31 : vector<8x128xi32>
        %c0_15 = arith.constant 0 : index
        %c0_16 = arith.constant 0 : index
        %33 = vector.load %arg6[%c0_15, %c0_16] : memref<8x128xf32, #tpu.memory_space<vmem>>, vector<8x128xf32>
        %34 = vector.broadcast %29 : vector<8x1xf32> to vector<8x128xf32>
        %35 = arith.subf %33, %34 : vector<8x128xf32>
        %cst_17 = arith.constant 0.000000e+00 : f32
        %36 = vector.broadcast %cst_17 : f32 to vector<8x128xf32>
        %37 = arith.select %32, %35, %36 : vector<8x128xi1>, vector<8x128xf32>
        %38 = arith.mulf %37, %37 : vector<8x128xf32>
        %cst_18 = arith.constant dense<0.000000e+00> : vector<8xf32>
        %39 = vector.multi_reduction <add>, %38, %cst_18 [1] : vector<8x128xf32> to vector<8xf32>
        %40 = vector.shape_cast %39 : vector<8xf32> to vector<8x1xf32>
        %cst_19 = arith.constant 1.562500e-02 : f32
        %41 = vector.broadcast %cst_19 : f32 to vector<8x1xf32>
        %42 = arith.mulf %40, %41 : vector<8x1xf32>
        %c0_20 = arith.constant 0 : index
        %c0_21 = arith.constant 0 : index
        %43 = vector.load %arg7[%c0_20, %c0_21] : memref<8x1xf32, #tpu.memory_space<vmem>>, vector<8x1xf32>
        tpu.vector_store %arg7[%c0_20, %c0_21], %29 {strides = array<i32>} : memref<8x1xf32, #tpu.memory_space<vmem>>, vector<8x1xf32>,
        %cst_22 = arith.constant 9.99999974E-6 : f32
        %44 = vector.broadcast %cst_22 : f32 to vector<8x1xf32>
        %45 = arith.addf %42, %44 : vector<8x1xf32>
        %46 = math.rsqrt %45 : vector<8x1xf32>
        %c0_23 = arith.constant 0 : index
        %c0_24 = arith.constant 0 : index
        %47 = vector.load %arg8[%c0_23, %c0_24] : memref<8x1xf32, #tpu.memory_space<vmem>>, vector<8x1xf32>
        tpu.vector_store %arg8[%c0_23, %c0_24], %46 {strides = array<i32>} : memref<8x1xf32, #tpu.memory_space<vmem>>, vector<8x1xf32>,
      } else {
      }
      %c0 = arith.constant 0 : index
      %11 = arith.index_cast %1 : i32 to index
      %12 = vector.load %arg6[%c0, %11] : memref<8x128xf32, #tpu.memory_space<vmem>>, vector<8x128xf32>
      %c0_4 = arith.constant 0 : index
      %c0_5 = arith.constant 0 : index
      %13 = vector.load %arg7[%c0_4, %c0_5] : memref<8x1xf32, #tpu.memory_space<vmem>>, vector<8x1xf32>
      %14 = vector.broadcast %13 : vector<8x1xf32> to vector<8x128xf32>
      %15 = arith.subf %12, %14 : vector<8x128xf32>
      %c0_6 = arith.constant 0 : index
      %c0_7 = arith.constant 0 : index
      %16 = vector.load %arg8[%c0_6, %c0_7] : memref<8x1xf32, #tpu.memory_space<vmem>>, vector<8x1xf32>
      %17 = vector.broadcast %16 : vector<8x1xf32> to vector<8x128xf32>
      %18 = arith.mulf %15, %17 : vector<8x128xf32>
      %cst = arith.constant 0.000000e+00 : f32
      %19 = vector.broadcast %cst : f32 to vector<8x128xf32>
      %20 = arith.cmpf oge, %18, %19 : vector<8x128xf32>
      %cst_8 = arith.constant 2.000000e-01 : f32
      %21 = vector.broadcast %cst_8 : f32 to vector<8x128xf32>
      %22 = arith.mulf %21, %18 : vector<8x128xf32>
      %23 = arith.select %20, %18, %22 : vector<8x128xi1>, vector<8x128xf32>
      %c0_9 = arith.constant 0 : index
      %c0_10 = arith.constant 0 : index
      %c0_11 = arith.constant 0 : index
      %24 = vector.load %arg5[%c0_9, %c0_10, %c0_11] : memref<1x8x128xf32, #tpu.memory_space<vmem>>, vector<1x8x128xf32>
      %25 = vector.shape_cast %24 : vector<1x8x128xf32> to vector<8x128xf32>
      %26 = vector.shape_cast %23 : vector<8x128xf32> to vector<1x8x128xf32>
      tpu.vector_store %arg5[%c0_9, %c0_10, %c0_11], %26 {strides = array<i32>} : memref<1x8x128xf32, #tpu.memory_space<vmem>>, vector<1x8x128xf32>,
    } else {
    }
    return
  }
  func.func @transform_0(%arg0: i32, %arg1: i32, %arg2: i32) -> (i32, i32, i32) {
    %c1_i32 = arith.constant 1 : i32
    %0 = arith.subi %c1_i32, %arg1 : i32
    %1 = arith.muli %0, %arg2 : i32
    %c0_i32 = arith.constant 0 : i32
    %2 = arith.muli %arg1, %c0_i32 : i32
    %3 = arith.addi %1, %2 : i32
    %c0_i32_0 = arith.constant 0 : i32
    %c0_i32_1 = arith.constant 0 : i32
    return %arg0, %c0_i32_0, %3 : i32, i32, i32
  }
  func.func @transform_1(%arg0: i32, %arg1: i32, %arg2: i32) -> (i32, i32) {
    %c0_i32 = arith.constant 0 : i32
    %c0_i32_0 = arith.constant 0 : i32
    %c0_i32_1 = arith.constant 0 : i32
    return %c0_i32, %c0_i32_0 : i32, i32
  }
  func.func @transform_2(%arg0: i32, %arg1: i32, %arg2: i32) -> (i32, i32, i32) {
    %0 = arith.muli %arg1, %arg2 : i32
    %c0_i32 = arith.constant 0 : i32
    %c0_i32_0 = arith.constant 0 : i32
    return %arg0, %c0_i32, %0 : i32, i32, i32
  }
}

</mosaic_0001>

<bundles_post_ra>
// kernel: block_forward.1
= control target key start
LH: loop header
LB: loop body
LE: loop exit
PB: predicated region body
PF: predicated region fallthrough
CT: control target
= control target key end

     0   :  { %s583_s9 = smov 0   ;;  %s585_s10 = smov 0   ;;  %s646_s0 = inlined_call_operand.vmem [shape: bf16[2,64,128], index: 0, kind: input, shape index: {}]   ;;  %s647_s1 = inlined_call_operand.vmem [shape: bf16[8,64], index: 1, kind: input, shape index: {}]   ;;  %s648_s2 = inlined_call_operand.vmem [shape: f32[2,8,128], index: 2, kind: output, shape index: {}]  }
   0x1   :  { %s587_s11 = smov 0   ;;  %s589_s12 = smov 0  }
   0x2   :  { %s591_s13 = smov 0  }
   0x3 LB: > { %s27_s14 = sadd.s32 1, %s555_s11  ;;  %s31_s15 = sadd.s32 1, %s559_s12  ;;  %s563_s13 = sphi %s591_s13, %s12_s13   ;;  %s559_s12 = sphi %s589_s12, %s652_s12   ;;  %s555_s11 = sphi %s587_s11, %s651_s11   ;;  %s551_s10 = sphi %s585_s10, %s650_s10   ;;  %s547_s9 = sphi %s583_s9, %s649_s9  }
   0x4   : > { %p29_p0 = scmp.ge.s32.totalorder %s27_s14, 2  ;;  %p443_p1 = scmp.ge.s32.totalorder %s563_s13, 1 }
   0x5   : > { %p148_p2 = scmp.lt.s32.totalorder %s563_s13, 5 }
   0x6   : > { %s654_s14 = smov (%p29_p0, %s27_s14), 0  ;;  %s656_s15 = smov (!%p29_p0, %s31_s15), %s559_s12 }
   0x7   : > { %p149_p3 = pnand %p443_p1, %p148_p2  ;;  %p33_p4 = scmp.ge.s32.totalorder %s656_s15, 2 }
   0x8   : > { %p180_p5 = scmp.lt.s32.totalorder (!%p149_p3), %s551_s10, 1  ;;  %p447_p6 = scmp.ne.s32.totalorder (!%p149_p3), %s547_s9, 0 }
   0x9   : > { %s658_s15 = smov (%p33_p4, %s656_s15), 0  ;;  %152 = sbr.rel (%p149_p3) target bundleno = 833 (0x341), region = 28 }
  0x10   : > { %s660_s10 = smov (!%p180_p5, %s551_s10), 1  ;;  %204 = sbr.rel (%p447_p6) target bundleno = 392 (0x188), region = 32 }
  0x11   : > { %s456_s16 = sshll.u32 %s660_s10, 5  ;;  %s446_s17 = sshll.u32 %s660_s10, 3  ;;  %v565_v1 = vmov (!%p447_p6), 0.0   ;;  %vm566_vm0 = vmmov (!%p447_p6), 0   ;;  %v211_v5 = vld [vmem:[%s647_s1] sm:$0xf] (!%p447_p6) }
  0x12   : > { %s187_s20 = scalar_lea.vmem %s646_s0, %s456_s16  ;;  %s621_s23 = scalar_lea.vmem %s648_s2, %s446_s17  ;;  %462 = vmatprep.subr.bf16.mxu0 (!%p447_p6), %v565_v1  ;;  %470 = vmatprep.mubr.msk.bf16.mxu0 (!%p447_p6), %vm566_vm0, %v565_v1  ;;  %vm244_vm1 = vcmask (!%p447_p6), 523264   ;;  %vm209_vm2 = vcmask (!%p447_p6), 7168  }
  0x13   : > { %v517_v0 = vld [vmem:[%s187_s20] sm:$0xff] (!%p447_p6)   ;;  %v518_v2 = vld [vmem:[%s187_s20 + $0x8] sm:$0xff] (!%p447_p6)   ;;  %v519_v3 = vld [vmem:[%s187_s20 + $0x10] sm:$0xff] (!%p447_p6)   ;;  %210 = vst.msk [vmem:[#allocation3] sm:$0xff] (!%p447_p6), %vm209_vm2, %v565_v1 }
  0x14   : > { %463 = vmatpush3.bf16.msra.mxu0 (!%p447_p6), %v517_v0  ;;  %v520_v4 = vld [vmem:[%s187_s20 + $0x18] sm:$0xff] (!%p447_p6)  }
  0x15   : > { %464 = vmatprep.subr.bf16.mxu0 (!%p447_p6), %v565_v1 }
  0x18   : > { %465 = vmatpush3.bf16.msra.mxu0 %v518_v2 }
  0x19   : > { %466 = vmatprep.subr.bf16.mxu0 %v565_v1 }
  0x1a   : > { %v292_v10 = vld [vmem:[#allocation3] sm:$0xff] }
  0x1c   : > { %467 = vmatpush3.bf16.msra.mxu0 %v519_v3 }
  0x1d   : > { %468 = vmatprep.subr.bf16.mxu0 %v565_v1 }
  0x20   : > { %469 = vmatpush3.bf16.msra.mxu0 %v520_v4 }
  0x23   : > { %471 = vmatmul.mubr.msk.bf16.vlgmr.msra.gmra.mrb[0].mxu0 %vm244_vm1, %v211_v5 }
  0xf6   : > { %v282_v6 = vpop.f32.mrb[0].mxu0 }
  0xf7   : > { %291 = vst [vmem:[#allocation2] sm:$0xff] %v282_v6  ;;  %v472_v7 = vpop.f32.mrb[1].mxu0  ;;  %293 = vadd.xlane.f32.xlu0 %v282_v6 }
  0xf8   : > { %v285_v8 = vpop.f32.mrb[2].mxu0 }
  0xf9   : > { %v473_v9 = vpop.f32.mrb[3].mxu0 }
 0x184   : > { %v294_v11 = vpop.xlane.xlu0 %293 }
 0x185   : > { %v295_v12 = vadd.f32 %v294_v11, %v292_v10 }
 0x187   : > { %297 = vst.msk [vmem:[#allocation3] sm:$0xff] %vm209_vm2, %v295_v12 }
 0x188 PF: > { %p453_p7 = scmp.ne.s32.totalorder %s547_s9, 1 }
 0x189   : > { %vm323_vm3 = vcmask (!%p453_p7), 7168   ;;  %v567_v14 = vmov (!%p453_p7), 0   ;;  %v308_v16 = vlaneseq (!%p453_p7)  ;;  %v311_v18 = vld [vmem:[#allocation2] sm:$0xff] (!%p453_p7) }
 0x18a   : > { %301 = sbr.rel (%p453_p7) target bundleno = 833 (0x341), region = 40  ;;  %521 = vset.pattern.permute.xlu0 (!%p453_p7), %v567_v14  ;;  %522 = vset.pattern.permute.xlu1 (!%p453_p7), %v567_v14 }
 0x18b   : > { %v309_v17 = vand.u32 (!%p453_p7), 127, %v308_v16 }
 0x18d   : > { %vm310_vm4 = vcmp.lt.s32.totalorder (!%p453_p7), %v309_v17, 64 }
 0x18e   : > { %v306_v13 = vld [vmem:[#allocation3] sm:$0xff] (!%p453_p7) }
 0x18f   : > { %v307_v15 = vmul.f32 (!%p453_p7), 0.015625, %v306_v13 }
 0x191   : > { %314 = vperm.xlu0 %521, %v307_v15   ;;  %324 = vst.msk [vmem:[#allocation3] sm:$0xff] %vm323_vm3, %v307_v15 }
 0x198   : > { %v332_v23 = vld [vmem:[#allocation3] sm:$0xff] }
 0x199   : > { %335 = vperm.xlu1 %522, %v332_v23  }
 0x210   : > { %v315_v19 = vpop.permute.xlu0 %314 }
 0x211   : > { %v317_v20 = vsub.f32 %v311_v18, %v315_v19 }
 0x213   : > { %v318_v21 = vsel %vm310_vm4, %v317_v20, 0.0 }
 0x214   : > { %v319_v22 = vmul.f32 %v318_v21, %v318_v21 }
 0x216   : > { %320 = vadd.xlane.f32.xlu0 %v319_v22 }
 0x218   : > { %v336_v29 = vpop.permute.xlu1 %335 }
 0x219   : > { %v338_v30 = vsub.f32 %v311_v18, %v336_v29 }
 0x2a3   : > { %v321_v24 = vpop.xlane.xlu0 %320 }
 0x2a4   : > { %v322_v25 = vmul.f32 0.015625, %v321_v24 }
 0x2a6   : > { %v325_v26 = vadd.f32 1e-05, %v322_v25 }
 0x2a8   : > { %523 = vrsqrt.f32 %v325_v26 }
 0x2b2   : > { %v524_v27 = vpop.eup %523 }
 0x2b3   : > { %327 = vst.msk [vmem:[#allocation4] sm:$0xff] %vm323_vm3, %v524_v27 }
 0x2ba   : > { %v339_v28 = vld [vmem:[#allocation4] sm:$0xff] }
 0x2bb   : > { %342 = vperm.xlu1 %522, %v339_v28  }
 0x33a   : > { %v343_v31 = vpop.permute.xlu1 %342 }
 0x33b   : > { %v345_v32 = vmul.f32 %v343_v31, %v338_v30 }
 0x33d   : > { %vm346_vm5 = vcmp.ge.f32.partialorder %v345_v32, 0.0  ;;  %v347_v33 = vmul.f32 0.2, %v345_v32 }
 0x33f   : > { %v348_v34 = vsel %vm346_vm5, %v345_v32, %v347_v33 }
 0x340   : > { %349 = vst [vmem:[%s621_s23] sm:$0xff] %v348_v34 }
 0x341 PF: > { %s12_s13 = sadd.s32 1, %s563_s13   ;;  %s649_s9 = smov %s555_s11 }
 0x342   : > { %p9_p8 = scmp.ge.s32.totalorder %s12_s13, 6   ;;  %s650_s10 = smov %s559_s12 }
 0x343   : > { %s651_s11 = smov %s654_s14  ;;  %s652_s12 = smov %s658_s15 }
 0x344   :  { %11 = sbr.rel (!%p9_p8) target bundleno = 3 (0x3), region = 76 }

</bundles_post_ra>
